<compile_context>
chip_gen: v6e
topology: v6e:2x2x1
jax: 0.10.0
libtpu: 0.0.40
codegen_flags: <defaults>
</compile_context>

<pallas_src>
import functools

import jax
import jax.numpy as jnp
from jax.experimental import pallas as pl
from jax.experimental.pallas import tpu as pltpu


def _attention_old_kernel(x_ref, w_cat_ref, o_ref, *, num_classes, num_experts):
    # x_ref:     (TB, E, C)   a tile of TB batch elements
    # w_cat_ref: (C, 2C + E)  [Wq^T | Wk^T | Wv] fused weight
    # o_ref:     (TB, E, E)   context vectors for this tile
    TB, E, C = x_ref.shape

    # Fused projection: one lane/sublane-dense matmul instead of 3 tiny ones.
    xf = x_ref[...].reshape(TB * E, C)                       # (TB*E, C)
    proj = jnp.dot(xf, w_cat_ref[...],
                   preferred_element_type=jnp.float32)       # (TB*E, 2C+E)

    q = proj[:, :C].reshape(TB, E, C)
    k = proj[:, C:2 * C].reshape(TB, E, C)
    v = proj[:, 2 * C:].reshape(TB, E, E)

    # Q @ K^T without materializing K^T: contract the trailing C dims.
    scores = jnp.einsum("bec,bfc->bef", q, k,
                        preferred_element_type=jnp.float32)  # (TB, E, E)
    scores = scores * (1.0 / (num_classes ** 0.5))

    # PyTorch: F.softmax(alignment_scores, dim=1) on (B, E, E) -> normalize
    # over the *first* E axis (axis 1 here).
    s_max = jnp.max(scores, axis=1, keepdims=True)
    p = jnp.exp(scores - s_max)
    denom = jnp.sum(p, axis=1, keepdims=True)
    attn = p * pl.reciprocal(denom, approx=False)

    ctx = jnp.einsum("bef,bfg->beg", attn, v,
                     preferred_element_type=jnp.float32)     # (TB, E, E)
    o_ref[...] = ctx.astype(o_ref.dtype)


def attention_old_forward(expert_outputs, wq, wk, wv, *, block_b=256):
    """expert_outputs: (B, E, C); wq, wk: (C, C) PyTorch Linear weights; wv: (C, E)."""
    B, E, C = expert_outputs.shape

    # Glue: Linear applies x @ W^T; fuse Wq^T, Wk^T, Wv into one (C, 2C+E) weight.
    w_cat = jnp.concatenate([wq.T, wk.T, wv], axis=1)

    # Batch TB elements per grid step; pad B up to a multiple of TB.
    TB = min(block_b, B)
    n_blocks = pl.cdiv(B, TB)
    B_pad = n_blocks * TB
    x = expert_outputs
    if B_pad != B:
        x = jnp.pad(x, ((0, B_pad - B), (0, 0), (0, 0)))

    kernel = functools.partial(_attention_old_kernel,
                               num_classes=C, num_experts=E)

    out = pl.pallas_call(
        kernel,
        out_shape=jax.ShapeDtypeStruct((B_pad, E, E), expert_outputs.dtype),
        grid_spec=pltpu.PrefetchScalarGridSpec(
            num_scalar_prefetch=0,
            grid=(n_blocks,),
            in_specs=[
                # Trailing block dims equal full array dims -> legal even though
                # E=8 / C=16 are not (8,128)-divisible.
                pl.BlockSpec((TB, E, C), lambda b: (b, 0, 0)),
                pl.BlockSpec((C, 2 * C + E), lambda b: (0, 0)),
            ],
            out_specs=pl.BlockSpec((TB, E, E), lambda b: (b, 0, 0)),
        ),
        compiler_params=pltpu.CompilerParams(
            dimension_semantics=("parallel",)),
    )(x, w_cat)

    if B_pad != B:
        out = out[:B]
    return out


def _reference(expert_outputs, wq, wk, wv):
    C = expert_outputs.shape[-1]
    Q = expert_outputs @ wq.T
    K = expert_outputs @ wk.T
    V = expert_outputs @ wv
    scores = (Q @ jnp.swapaxes(K, 2, 1)) / (C ** 0.5)
    attn = jax.nn.softmax(scores, axis=1)
    return attn @ V


if __name__ == "__main__":
    num_experts = 8     # E
    num_classes = 16    # C

    key = jax.random.PRNGKey(0)
    k0, k1, k2, k3 = jax.random.split(key, 4)
    wq = jax.random.normal(k1, (num_classes, num_classes), jnp.float32) * 0.1
    wk = jax.random.normal(k2, (num_classes, num_classes), jnp.float32) * 0.1
    wv = jax.random.normal(k3, (num_classes, num_experts), jnp.float32) * 0.1

    # Case 1: original tiny batch, single grid step.
    batch = 2
    x1 = jax.random.normal(k0, (batch, num_experts, num_classes), jnp.float32)
    out1 = jax.block_until_ready(attention_old_forward(x1, wq, wk, wv))
    ref1 = _reference(x1, wq, wk, wv)
    assert out1.shape == (batch, num_experts, num_experts)
    assert jnp.allclose(out1, ref1, atol=1e-5, rtol=1e-5), "mismatch vs reference (case 1)"

    # Case 2: batch not a multiple of the block -> exercises padding + multi-step grid.
    batch2 = 10
    x2 = jax.random.normal(jax.random.PRNGKey(7),
                           (batch2, num_experts, num_classes), jnp.float32)
    out2 = jax.block_until_ready(attention_old_forward(x2, wq, wk, wv, block_b=4))
    ref2 = _reference(x2, wq, wk, wv)
    assert out2.shape == (batch2, num_experts, num_experts)
    assert jnp.allclose(out2, ref2, atol=1e-5, rtol=1e-5), "mismatch vs reference (case 2)"

    print("KERNEL_OK")
</pallas_src>

<mosaic_0001>
module attributes {stable_mosaic.version = 11 : i64} {
  func.func @_attention_old_kernel(%arg0: i32, %arg1: memref<2x8x16xf32, #tpu.memory_space<vmem>>, %arg2: memref<16x40xf32, #tpu.memory_space<vmem>>, %arg3: memref<2x8x8xf32, #tpu.memory_space<vmem>>) attributes {dimension_semantics = [#tpu.dimension_semantics<parallel>], iteration_bounds = array<i64: 1>, scalar_prefetch = 0 : i64, scratch_operands = 0 : i64, tpu.core_type = #tpu.core_type<tc>, window_params = [{transform_indices = @transform_0, window_bounds = array<i64: 2, 8, 16>}, {pipeline_mode = #tpu.pipeline_mode<synchronous>, transform_indices = @transform_1, window_bounds = array<i64: 16, 40>}, {transform_indices = @transform_2, window_bounds = array<i64: 2, 8, 8>}]} {
    %c0 = arith.constant 0 : index
    %c0_0 = arith.constant 0 : index
    %c0_1 = arith.constant 0 : index
    %0 = vector.load %arg1[%c0, %c0_0, %c0_1] : memref<2x8x16xf32, #tpu.memory_space<vmem>>, vector<2x8x16xf32>
    %1 = vector.shape_cast %0 : vector<2x8x16xf32> to vector<16x16xf32>
    %c0_2 = arith.constant 0 : index
    %c0_3 = arith.constant 0 : index
    %2 = vector.load %arg2[%c0_2, %c0_3] : memref<16x40xf32, #tpu.memory_space<vmem>>, vector<16x40xf32>
    %cst = arith.constant dense<0.000000e+00> : vector<16x40xf32>
    %3 = tpu.matmul %1, %2, %cst {dimension_numbers = #tpu.dot_dimension_numbers<[1], [0], [0], [1], [0, 0, 1, 1], [], []>} : vector<16x16xf32>, vector<16x40xf32>, vector<16x40xf32> -> vector<16x40xf32>
    %4 = vector.extract_strided_slice %3 {offsets = [0, 0], sizes = [16, 16], strides = [1, 1]} : vector<16x40xf32> to vector<16x16xf32>
    %5 = vector.shape_cast %4 : vector<16x16xf32> to vector<2x8x16xf32>
    %6 = vector.extract_strided_slice %3 {offsets = [0, 16], sizes = [16, 16], strides = [1, 1]} : vector<16x40xf32> to vector<16x16xf32>
    %7 = vector.shape_cast %6 : vector<16x16xf32> to vector<2x8x16xf32>
    %8 = vector.extract_strided_slice %3 {offsets = [0, 32], sizes = [16, 8], strides = [1, 1]} : vector<16x40xf32> to vector<16x8xf32>
    %9 = vector.shape_cast %8 : vector<16x8xf32> to vector<2x8x8xf32>
    "tpu.trace_start"() <{level = 10 : i32, message = "bec,bfc->bef"}> : () -> ()
    %cst_4 = arith.constant dense<0.000000e+00> : vector<2x8x8xf32>
    %10 = tpu.matmul %5, %7, %cst_4 {dimension_numbers = #tpu.dot_dimension_numbers<[2], [2], [1], [1], [0, 0, 0, 1, 1, 1], [0], [0]>} : vector<2x8x16xf32>, vector<2x8x16xf32>, vector<2x8x8xf32> -> vector<2x8x8xf32>
    "tpu.trace_stop"() : () -> ()
    %cst_5 = arith.constant 2.500000e-01 : f32
    %11 = vector.broadcast %cst_5 : f32 to vector<2x8x8xf32>
    %12 = arith.mulf %10, %11 : vector<2x8x8xf32>
    %cst_6 = arith.constant dense<0xFF800000> : vector<2x8xf32>
    %13 = vector.multi_reduction <maximumf>, %12, %cst_6 [1] : vector<2x8x8xf32> to vector<2x8xf32>
    %14 = vector.shape_cast %13 : vector<2x8xf32> to vector<2x1x8xf32>
    %15 = vector.broadcast %14 : vector<2x1x8xf32> to vector<2x8x8xf32>
    %16 = arith.subf %12, %15 : vector<2x8x8xf32>
    %17 = math.exp %16 : vector<2x8x8xf32>
    %cst_7 = arith.constant dense<0.000000e+00> : vector<2x8xf32>
    %18 = vector.multi_reduction <add>, %17, %cst_7 [1] : vector<2x8x8xf32> to vector<2x8xf32>
    %19 = vector.shape_cast %18 : vector<2x8xf32> to vector<2x1x8xf32>
    %20 = tpu.reciprocal %19 : vector<2x1x8xf32> -> vector<2x1x8xf32>
    %21 = vector.broadcast %20 : vector<2x1x8xf32> to vector<2x8x8xf32>
    %22 = arith.mulf %17, %21 : vector<2x8x8xf32>
    "tpu.trace_start"() <{level = 10 : i32, message = "bef,bfg->beg"}> : () -> ()
    %cst_8 = arith.constant dense<0.000000e+00> : vector<2x8x8xf32>
    %23 = tpu.matmul %22, %9, %cst_8 {dimension_numbers = #tpu.dot_dimension_numbers<[2], [1], [1], [2], [0, 0, 0, 1, 1, 2], [0], [0]>} : vector<2x8x8xf32>, vector<2x8x8xf32>, vector<2x8x8xf32> -> vector<2x8x8xf32>
    "tpu.trace_stop"() : () -> ()
    %c0_9 = arith.constant 0 : index
    %c0_10 = arith.constant 0 : index
    %c0_11 = arith.constant 0 : index
    %24 = vector.load %arg3[%c0_9, %c0_10, %c0_11] : memref<2x8x8xf32, #tpu.memory_space<vmem>>, vector<2x8x8xf32>
    tpu.vector_store %arg3[%c0_9, %c0_10, %c0_11], %23 {strides = array<i32>} : memref<2x8x8xf32, #tpu.memory_space<vmem>>, vector<2x8x8xf32>,
    return
  }
  func.func @transform_0(%arg0: i32) -> (i32, i32, i32) {
    %c0_i32 = arith.constant 0 : i32
    %c0_i32_0 = arith.constant 0 : i32
    %c0_i32_1 = arith.constant 0 : i32
    return %arg0, %c0_i32, %c0_i32_0 : i32, i32, i32
  }
  func.func @transform_1(%arg0: i32) -> (i32, i32) {
    %c0_i32 = arith.constant 0 : i32
    %c0_i32_0 = arith.constant 0 : i32
    %c0_i32_1 = arith.constant 0 : i32
    return %c0_i32, %c0_i32_0 : i32, i32
  }
  func.func @transform_2(%arg0: i32) -> (i32, i32, i32) {
    %c0_i32 = arith.constant 0 : i32
    %c0_i32_0 = arith.constant 0 : i32
    %c0_i32_1 = arith.constant 0 : i32
    return %arg0, %c0_i32, %c0_i32_0 : i32, i32, i32
  }
}

</mosaic_0001>

<bundles_post_ra>
// kernel: tpu_custom_call.1
= control target key start
LH: loop header
LB: loop body
LE: loop exit
PB: predicated region body
PF: predicated region fallthrough
CT: control target
= control target key end

     0   :  { %7 = vsyncpa [#allocation3], 0  ;;  %s683_s0 = inlined_call_operand.hbm [shape: f32[2,8,16], index: 0, kind: input, shape index: {}]   ;;  %s684_s1 = inlined_call_operand.hbm [shape: f32[16,40], index: 1, kind: input, shape index: {}]   ;;  %s685_s2 = inlined_call_operand.hbm [shape: f32[2,8,8], index: 2, kind: output, shape index: {}]  }
   0x1   :  { %8 = vsyncpa [#allocation6], 0 }
   0x2   :  { %9 = vsyncpa [#allocation4], 0  ;;  %s623_s9 = smov [#allocation2]  }
   0x3   :  { %s15_s10 = sshll.u32 %s623_s9, 4  ;;  %s16_s10 = int_to_ptr.vmem [resolvable:$true] %s15_s10 }
   0x4   :  { %s565_s11 = scalar_lea.vmem %s16_s10, 256  ;;  %p570_p1 = scmp.lt.s32.totalorder %s16_s10, %s16_s10 }
   0x5   :  { %p566_p0 = scmp.ne.s32.totalorder %s16_s10, %s565_s11  ;;  %p571_p2 = scmp.lt.s32.totalorder %s565_s11, %s565_s11 }
   0x7   :  { %p572_p3 = por %p571_p2, %p570_p1 }
   0x9   :  { %p573_p4 = pnand %p572_p3, %p566_p0 }
   0xb   :  { %576 = shalt.err (!%p573_p4)
}
   0xc   :  { %s624_s12 = smov 128   ;;  %s625_s13 = smov 8  }
   0xd   :  { %21 = dma.hbm_to_vmem [thread:$0]  %s683_s0, 256, %s16_s10, [#allocation3], %s624_s12, %s624_s12, %s625_s13  }
   0xe   :  { %s626_s16 = smov [#allocation5]  }
   0xf   :  { %s27_s17 = sshll.u32 %s626_s16, 4  ;;  %s28_s17 = int_to_ptr.vmem [resolvable:$true] %s27_s17 }
  0x10   :  { %s585_s18 = scalar_lea.vmem %s28_s17, 256  ;;  %p590_p6 = scmp.lt.s32.totalorder %s28_s17, %s28_s17 }
  0x11   :  { %p586_p5 = scmp.ne.s32.totalorder %s28_s17, %s585_s18  ;;  %p591_p7 = scmp.lt.s32.totalorder %s585_s18, %s585_s18 }
  0x13   :  { %p592_p8 = por %p591_p7, %p590_p6 }
  0x15   :  { %p593_p9 = pnand %p592_p8, %p586_p5 }
  0x17   :  { %596 = shalt.err (!%p593_p9)
}
  0x18   :  { %33 = dma.hbm_to_vmem [thread:$0]  %s684_s1, 256, %s28_s17, [#allocation6], %s624_s12, %s624_s12, %s625_s13  }
  0x19   :  { %617 = dma.done.wait [#allocation3], 256  }
  0x1a   :  { %618 = vsyncadd [#allocation3], 4294967040 }
  0x1b   :  { %619 = dma.done.wait [#allocation6], 256  }
  0x1c   :  { %620 = vsyncadd [#allocation6], 4294967040  ;;  %vm44_vm0 = vcmask 130048   ;;  %v43_v0 = vld [vmem:[#allocation5 + $0x8] sm:$0xff]  ;;  %v42_v1 = vld [vmem:[#allocation5] sm:$0xff]  ;;  %v627_v4 = vmov 0.0  }
  0x1d   :  { %v40_v2 = vld [vmem:[#allocation2] sm:$0xff]  ;;  %513 = vmatprep.subr.mxu0 %v43_v0  ;;  %v41_v3 = vld [vmem:[#allocation2 + $0x8] sm:$0xff]  ;;  %520 = vmatprep.subr.mxu1 %v627_v4  ;;  %vm628_vm1 = vmmov 0   ;;  %s629_s0 = smov 96   ;;  %s630_s1 = smov 112   ;;  %vm282_vm2 = vcmask 64512  }
  0x1e   :  { %517 = vmatprep.mubr.msk.f32.mxu0 %vm44_vm0, %v40_v2  ;;  %514 = vmatpush3.msra.mxu0 %v43_v0  ;;  %s631_s21 = smov [#allocation7]  }
  0x1f   :  { %515 = vmatprep.subr.mxu0 %v42_v1  ;;  %522 = vmatprep.mubr.msk.f32.mxu1 %vm628_vm1, %v627_v4  ;;  %s480_s22 = sshll.u32 %s631_s21, 4  ;;  %s481_s22 = int_to_ptr.vmem [resolvable:$true] %s480_s22 }
  0x20   :  { %516 = vmatpush3.msra.mxu0 %v42_v1  ;;  %s597_s23 = scalar_lea.vmem %s481_s22, 256  ;;  %p602_p11 = scmp.lt.s32.totalorder %s481_s22, %s481_s22 }
  0x21   :  { %518 = vmatmul.mubr.msk.f32.vlgmr.msra.gmra.mxu0 %vm44_vm0, %v41_v3  ;;  %525 = vmatprep.subr.mxu0 %v627_v4  ;;  %p598_p10 = scmp.ne.s32.totalorder %s481_s22, %s597_s23  ;;  %p603_p12 = scmp.lt.s32.totalorder %s597_s23, %s597_s23 }
  0x22   :  { %527 = vmatprep.mubr.msk.f32.mxu0 %vm628_vm1, %v627_v4 }
  0x23   :  { %p604_p13 = por %p603_p12, %p602_p11 }
  0x25   :  { %p605_p0 = pnand %p604_p13, %p598_p10 }
  0xe1   :  { %v519_v5 = vpop.f32.mrf.mxu0 }
  0xe3   :  { %v117_v6 = vpop.f32.mrf.mxu0 }
  0xe4   :  { %321 = vrot.lane.b32.xlu1 %v117_v6, %s629_s0  ;;  %127 = vrot.lane.b32.xlu0 %v117_v6, %s630_s1 }
  0xe8   :  { %397 = vrot.lane.b32.xlu1 %v519_v5, %s629_s0  ;;  %204 = vrot.lane.b32.xlu0 %v519_v5, %s630_s1 }
 0x156   :  { %v128_v7 = vpop.permute.xlu0 %127  ;;  %v322_v8 = vpop.permute.xlu1 %321 }
 0x157   :  { %521 = vmatpush3.xpose.msk.msra.mxu1 %vm44_vm0, %v128_v7 }
 0x158   :  { %530 = vmatprep.subr.mxu1 %v627_v4 }
 0x15a   :  { %523 = vmatmul.mubr.msk.f32.vlgmr.msra.gmra.mxu1 %vm44_vm0, %v117_v6  ;;  %v205_v9 = vpop.permute.xlu0 %204  ;;  %v398_v10 = vpop.permute.xlu1 %397 }
 0x15b   :  { %526 = vmatpush3.xpose.msk.msra.mxu0 %vm44_vm0, %v205_v9  ;;  %531 = vmatpush3.msra.mxu1 %v322_v8 }
 0x15c   :  { %535 = vmatprep.subr.mxu0 %v627_v4  ;;  %532 = vmatprep.mubr.msk.f32.mxu1 %vm628_vm1, %v627_v4 }
 0x15e   :  { %528 = vmatmul.mubr.msk.f32.vlgmr.msra.gmra.mxu0 %vm44_vm0, %v519_v5 }
 0x15f   :  { %536 = vmatpush3.msra.mxu0 %v398_v10  ;;  %537 = vmatprep.mubr.msk.f32.mxu0 %vm628_vm1, %v627_v4 }
 0x21a   :  { %v199_v11 = vpop.f32.mrf.mxu1 }
 0x21b   :  { %v280_v12 = vmul.f32 0.25, %v199_v11 }
 0x21c   :  { %v524_v13 = vpop.f32.mrf.mxu1 }
 0x21d   :  { %v283_v14 = vsel %vm282_vm2, %v280_v12, -inf }
 0x21e   :  { %v284_v15 = vrot.slane %v283_v14, 4  ;;  %v276_v16 = vpop.f32.mrf.mxu0 }
 0x21f   :  { %v281_v17 = vmul.f32 0.25, %v276_v16 }
 0x220   :  { %v285_v18 = vmax.f32 %v283_v14, %v284_v15  ;;  %v529_v19 = vpop.f32.mrf.mxu0 }
 0x221   :  { %v290_v20 = vsel %vm282_vm2, %v281_v17, -inf }
 0x222   :  { %v286_v21 = vrot.slane %v285_v18, 2  ;;  %v291_v22 = vrot.slane %v290_v20, 4 }
 0x224   :  { %v287_v23 = vmax.f32 %v285_v18, %v286_v21  ;;  %v292_v24 = vmax.f32 %v290_v20, %v291_v22 }
 0x226   :  { %v288_v25 = vrot.slane %v287_v23, 1  ;;  %v293_v26 = vrot.slane %v292_v24, 2 }
 0x228   :  { %v289_v27 = vmax.f32 %v287_v23, %v288_v25  ;;  %v294_v28 = vmax.f32 %v292_v24, %v293_v26 }
 0x22a   :  { %v297_v29 = vsub.f32 %v280_v12, %v289_v27  ;;  %v295_v30 = vrot.slane %v294_v28, 1 }
 0x22c   :  { %v299_v31 = vmul.f32 1.442695, %v297_v29  ;;  %v296_v32 = vmax.f32 %v294_v28, %v295_v30 }
 0x22e   :  { %549 = vpow2.f32 %v299_v31  ;;  %v298_v33 = vsub.f32 %v281_v17, %v296_v32 }
 0x230   :  { %v301_v34 = vmul.f32 1.442695, %v298_v33 }
 0x232   :  { %551 = vpow2.f32 %v301_v34 }
 0x23b   :  { %v550_v35 = vpop.eup %549 }
 0x23c   :  { %v303_v36 = vsel %vm282_vm2, %v550_v35, 0.0 }
 0x23d   :  { %v304_v37 = vrot.slane %v303_v36, 4 }
 0x23f   :  { %v552_v38 = vpop.eup %551  ;;  %v305_v39 = vadd.f32 %v304_v37, %v303_v36 }
 0x240   :  { %v310_v40 = vsel %vm282_vm2, %v552_v38, 0.0 }
 0x241   :  { %v306_v41 = vrot.slane %v305_v39, 2  ;;  %v311_v42 = vrot.slane %v310_v40, 4 }
 0x243   :  { %v307_v43 = vadd.f32 %v306_v41, %v305_v39  ;;  %v312_v44 = vadd.f32 %v311_v42, %v310_v40 }
 0x245   :  { %v308_v45 = vrot.slane %v307_v43, 1  ;;  %v313_v46 = vrot.slane %v312_v44, 2 }
 0x247   :  { %v309_v47 = vadd.f32 %v308_v45, %v307_v43  ;;  %v314_v48 = vadd.f32 %v313_v46, %v312_v44 }
 0x249   :  { %553 = vrcp.f32 %v309_v47  ;;  %v315_v49 = vrot.slane %v314_v48, 1 }
 0x24b   :  { %v316_v50 = vadd.f32 %v315_v49, %v314_v48 }
 0x24d   :  { %555 = vrcp.f32 %v316_v50 }
 0x256   :  { %v554_v51 = vpop.eup %553 }
 0x257   :  { %v319_v52 = vmul.f32 %v554_v51, %v550_v35 }
 0x259   :  { %533 = vmatmul.mubr.msk.f32.vlgmr.msra.gmra.mxu1 %vm282_vm2, %v319_v52 }
 0x25a   :  { %v556_v53 = vpop.eup %555 }
 0x25b   :  { %v320_v54 = vmul.f32 %v556_v53, %v552_v38 }
 0x25d   :  { %538 = vmatmul.mubr.msk.f32.vlgmr.msra.gmra.mxu0 %vm282_vm2, %v320_v54 }
 0x319   :  { %v393_v55 = vpop.f32.mrf.mxu1 }
 0x31a   :  { %473 = vst.msk [vmem:[#allocation7] sm:$0xff] %vm282_vm2, %v393_v55 }
 0x31b   :  { %v534_v56 = vpop.f32.mrf.mxu1 }
 0x31d   :  { %v469_v57 = vpop.f32.mrf.mxu0 }
 0x31e   :  { %474 = vst.msk [vmem:[#allocation7 + $0x8] sm:$0xff] %vm282_vm2, %v469_v57 }
 0x31f   :  { %v539_v58 = vpop.f32.mrf.mxu0 }
 0x320   :  { %608 = shalt.err (!%p605_p0)
}
 0x321   :  { %486 = dma.vmem_to_hbm [thread:$0]  %s481_s22, 256, %s685_s2, [#allocation4], %s624_s12, %s624_s12, %s625_s13  }
 0x322   :  { %621 = dma.done.wait [#allocation4], 256  }
 0x323   :  { %622 = vsyncadd [#allocation4], 4294967040 }
 0x324   :  { %490 = vsyncpa [#allocation3], 1 }
 0x325   :  { %491 = vsyncpa [#allocation6], 1 }
 0x326   :  { %492 = vsyncpa [#allocation4], 1 }

</bundles_post_ra>
